<compile_context>
chip_gen: v7x
topology: tpu7x:2x2x1
jax: 0.10.0
libtpu: 0.0.40
codegen_flags: <defaults>
</compile_context>

<pallas_src>
import jax
import jax.numpy as jnp
from jax.experimental import pallas as pl
from jax.experimental.pallas import tpu as pltpu

LANE = 128
SUBLANE = 16                                  # bf16 sublane tile (safe on v5e/v6e/v7x)
# static row offsets inside the packed parameter slab
W1_OFF, W2_OFF, W3_OFF, BIAS_OFF = 0, 128, 256, 384
SLAB_ROWS = 400                               # 3*128 weight blocks + 16-row bias block


def mlp_kernel(x_ref, p_ref, o_ref):
    x = x_ref[...]                                        # (TB, 128) bf16, zero-padded
    w1 = p_ref[W1_OFF:W1_OFF + LANE, :]                   # (128, 128) bf16, zero-padded
    w2 = p_ref[W2_OFF:W2_OFF + LANE, :]
    w3 = p_ref[W3_OFF:W3_OFF + LANE, :]
    b1 = p_ref[BIAS_OFF + 0:BIAS_OFF + 1, :].astype(jnp.float32)   # (1, 128)
    b2 = p_ref[BIAS_OFF + 1:BIAS_OFF + 2, :].astype(jnp.float32)
    b3 = p_ref[BIAS_OFF + 2:BIAS_OFF + 3, :].astype(jnp.float32)

    # bf16 MXU dots with f32 accumulation; bias add + sigmoid in f32 (EUP),
    # re-pack activations to bf16 only as MXU inputs.
    h1 = jax.nn.sigmoid(jnp.dot(x, w1, preferred_element_type=jnp.float32) + b1)
    h2 = jax.nn.sigmoid(
        jnp.dot(h1.astype(jnp.bfloat16), w2, preferred_element_type=jnp.float32) + b2)
    h3 = jax.nn.sigmoid(
        jnp.dot(h2.astype(jnp.bfloat16), w3, preferred_element_type=jnp.float32) + b3)
    o_ref[...] = h3.astype(o_ref.dtype)                   # lane-dense unmasked store


def pack_params(w1, b1, w2, b2, w3, b3):
    """Zero-pad and pack all weights/biases into a single (400,128) bf16 slab."""
    p = jnp.zeros((SLAB_ROWS, LANE), jnp.float32)
    p = p.at[W1_OFF:W1_OFF + w1.shape[0], :w1.shape[1]].set(w1)   # (10,30)
    p = p.at[W2_OFF:W2_OFF + w2.shape[0], :w2.shape[1]].set(w2)   # (30,30)
    p = p.at[W3_OFF:W3_OFF + w3.shape[0], :w3.shape[1]].set(w3)   # (30,1)
    p = p.at[BIAS_OFF + 0, :b1.shape[-1]].set(b1.reshape(-1))
    p = p.at[BIAS_OFF + 1, :b2.shape[-1]].set(b2.reshape(-1))
    p = p.at[BIAS_OFF + 2, :b3.shape[-1]].set(b3.reshape(-1))
    return p.astype(jnp.bfloat16)


def mlp_forward(x, params_slab):
    B, F = x.shape
    # batch padded to bf16 sublane multiple; tile TB rows per grid step
    Bp = ((B + SUBLANE - 1) // SUBLANE) * SUBLANE
    TB = 512
    if Bp <= TB:
        TB = Bp
    else:
        Bp = ((Bp + TB - 1) // TB) * TB
    grid = (Bp // TB,)

    x_pad = jnp.zeros((Bp, LANE), jnp.bfloat16).at[:B, :F].set(x.astype(jnp.bfloat16))

    cost = pl.CostEstimate(
        flops=2 * Bp * LANE * LANE * 3,
        transcendentals=Bp * LANE * 3,
        bytes_accessed=Bp * LANE * 2 * 2 + SLAB_ROWS * LANE * 2,
    )

    out = pl.pallas_call(
        mlp_kernel,
        out_shape=jax.ShapeDtypeStruct((Bp, LANE), jnp.bfloat16),
        grid=grid,
        in_specs=[
            pl.BlockSpec((TB, LANE), lambda i: (i, 0)),            # x tile per step
            pl.BlockSpec((SLAB_ROWS, LANE), lambda i: (0, 0)),     # params resident
        ],
        out_specs=pl.BlockSpec((TB, LANE), lambda i: (i, 0)),
        compiler_params=pltpu.CompilerParams(
            dimension_semantics=("parallel",),        # v7x: shard batch over 2 TCs
            allow_input_fusion=[True, False],         # fuse the x zero-pad into the call
        ),
        cost_estimate=cost,
    )(x_pad, params_slab)
    return out[:B, :1].astype(jnp.float32)             # valid rows, column 0


def init_linear(key, fan_in, fan_out):
    # Mimic PyTorch nn.Linear default init: U(-1/sqrt(fan_in), 1/sqrt(fan_in)).
    kw, kb = jax.random.split(key)
    bound = 1.0 / (fan_in ** 0.5)
    # weight stored already transposed to (fan_in, fan_out) for x @ W
    w = jax.random.uniform(kw, (fan_in, fan_out), jnp.float32, -bound, bound)
    b = jax.random.uniform(kb, (1, fan_out), jnp.float32, -bound, bound)
    return w, b


if __name__ == "__main__":
    key = jax.random.PRNGKey(0)
    kx, k1, k2, k3 = jax.random.split(key, 4)

    B, F = 8, 10
    x = jax.random.normal(kx, (B, F), jnp.float32)

    w1, b1 = init_linear(k1, 10, 30)
    w2, b2 = init_linear(k2, 30, 30)
    w3, b3 = init_linear(k3, 30, 1)

    params_slab = pack_params(w1, b1, w2, b2, w3, b3)

    fwd = jax.jit(mlp_forward)
    y = jax.block_until_ready(fwd(x, params_slab))
    assert y.shape == (B, 1)

    # (1) semantic reference in full f32 (loose tolerance: kernel uses bf16 params/acts)
    ref = jax.nn.sigmoid(x @ w1 + b1)
    ref = jax.nn.sigmoid(ref @ w2 + b2)
    ref = jax.nn.sigmoid(ref @ w3 + b3)
    assert jnp.allclose(y, ref, atol=5e-2), "mismatch vs f32 reference"

    # (2) tight reference that mimics the kernel's bf16 rounding points
    def r(a):  # round-to-bf16-and-back
        return a.astype(jnp.bfloat16).astype(jnp.float32)
    h = jax.nn.sigmoid(r(x) @ r(w1) + r(b1))
    h = jax.nn.sigmoid(r(h) @ r(w2) + r(b2))
    h = r(jax.nn.sigmoid(r(h) @ r(w3) + r(b3)))
    assert jnp.allclose(y, h, atol=1e-2), "mismatch vs bf16-rounded reference"

    print("KERNEL_OK")
</pallas_src>

<mosaic_0001>
module attributes {stable_mosaic.version = 11 : i64} {
  func.func @mlp_kernel(%arg0: i32, %arg1: memref<16x128xbf16, #tpu.memory_space<vmem>>, %arg2: memref<400x128xbf16, #tpu.memory_space<vmem>>, %arg3: memref<16x128xbf16, #tpu.memory_space<vmem>>) attributes {dimension_semantics = [#tpu.dimension_semantics<parallel>], iteration_bounds = array<i64: 1>, scalar_prefetch = 0 : i64, scratch_operands = 0 : i64, tpu.core_type = #tpu.core_type<tc>, window_params = [{transform_indices = @transform_0, window_bounds = array<i64: 16, 128>}, {pipeline_mode = #tpu.pipeline_mode<synchronous>, transform_indices = @transform_1, window_bounds = array<i64: 400, 128>}, {transform_indices = @transform_2, window_bounds = array<i64: 16, 128>}]} {
    %c0 = arith.constant 0 : index
    %c0_0 = arith.constant 0 : index
    %0 = vector.load %arg1[%c0, %c0_0] : memref<16x128xbf16, #tpu.memory_space<vmem>>, vector<16x128xbf16>
    %c0_1 = arith.constant 0 : index
    %c0_2 = arith.constant 0 : index
    %1 = vector.load %arg2[%c0_1, %c0_2] : memref<400x128xbf16, #tpu.memory_space<vmem>>, vector<128x128xbf16>
    %c128 = arith.constant 128 : index
    %c0_3 = arith.constant 0 : index
    %2 = vector.load %arg2[%c128, %c0_3] : memref<400x128xbf16, #tpu.memory_space<vmem>>, vector<128x128xbf16>
    %c256 = arith.constant 256 : index
    %c0_4 = arith.constant 0 : index
    %3 = vector.load %arg2[%c256, %c0_4] : memref<400x128xbf16, #tpu.memory_space<vmem>>, vector<128x128xbf16>
    %c384 = arith.constant 384 : index
    %c0_5 = arith.constant 0 : index
    %4 = vector.load %arg2[%c384, %c0_5] : memref<400x128xbf16, #tpu.memory_space<vmem>>, vector<1x128xbf16>
    %5 = arith.extf %4 : vector<1x128xbf16> to vector<1x128xf32>
    %c385 = arith.constant 385 : index
    %c0_6 = arith.constant 0 : index
    %6 = vector.load %arg2[%c385, %c0_6] : memref<400x128xbf16, #tpu.memory_space<vmem>>, vector<1x128xbf16>
    %7 = arith.extf %6 : vector<1x128xbf16> to vector<1x128xf32>
    %c386 = arith.constant 386 : index
    %c0_7 = arith.constant 0 : index
    %8 = vector.load %arg2[%c386, %c0_7] : memref<400x128xbf16, #tpu.memory_space<vmem>>, vector<1x128xbf16>
    %9 = arith.extf %8 : vector<1x128xbf16> to vector<1x128xf32>
    %cst = arith.constant dense<0.000000e+00> : vector<16x128xf32>
    %10 = tpu.matmul %0, %1, %cst {dimension_numbers = #tpu.dot_dimension_numbers<[1], [0], [0], [1], [0, 0, 1, 1], [], []>} : vector<16x128xbf16>, vector<128x128xbf16>, vector<16x128xf32> -> vector<16x128xf32>
    %11 = vector.broadcast %5 : vector<1x128xf32> to vector<16x128xf32>
    %12 = arith.addf %10, %11 : vector<16x128xf32>
    %13 = arith.negf %12 : vector<16x128xf32>
    %14 = math.exp %13 : vector<16x128xf32>
    %cst_8 = arith.constant 1.000000e+00 : f32
    %15 = vector.broadcast %cst_8 : f32 to vector<16x128xf32>
    %16 = arith.addf %15, %14 : vector<16x128xf32>
    %17 = arith.divf %15, %16 : vector<16x128xf32>
    %18 = arith.truncf %17 : vector<16x128xf32> to vector<16x128xbf16>
    %cst_9 = arith.constant dense<0.000000e+00> : vector<16x128xf32>
    %19 = tpu.matmul %18, %2, %cst_9 {dimension_numbers = #tpu.dot_dimension_numbers<[1], [0], [0], [1], [0, 0, 1, 1], [], []>} : vector<16x128xbf16>, vector<128x128xbf16>, vector<16x128xf32> -> vector<16x128xf32>
    %20 = vector.broadcast %7 : vector<1x128xf32> to vector<16x128xf32>
    %21 = arith.addf %19, %20 : vector<16x128xf32>
    %22 = arith.negf %21 : vector<16x128xf32>
    %23 = math.exp %22 : vector<16x128xf32>
    %cst_10 = arith.constant 1.000000e+00 : f32
    %24 = vector.broadcast %cst_10 : f32 to vector<16x128xf32>
    %25 = arith.addf %24, %23 : vector<16x128xf32>
    %26 = arith.divf %24, %25 : vector<16x128xf32>
    %27 = arith.truncf %26 : vector<16x128xf32> to vector<16x128xbf16>
    %cst_11 = arith.constant dense<0.000000e+00> : vector<16x128xf32>
    %28 = tpu.matmul %27, %3, %cst_11 {dimension_numbers = #tpu.dot_dimension_numbers<[1], [0], [0], [1], [0, 0, 1, 1], [], []>} : vector<16x128xbf16>, vector<128x128xbf16>, vector<16x128xf32> -> vector<16x128xf32>
    %29 = vector.broadcast %9 : vector<1x128xf32> to vector<16x128xf32>
    %30 = arith.addf %28, %29 : vector<16x128xf32>
    %31 = arith.negf %30 : vector<16x128xf32>
    %32 = math.exp %31 : vector<16x128xf32>
    %cst_12 = arith.constant 1.000000e+00 : f32
    %33 = vector.broadcast %cst_12 : f32 to vector<16x128xf32>
    %34 = arith.addf %33, %32 : vector<16x128xf32>
    %35 = arith.divf %33, %34 : vector<16x128xf32>
    %36 = arith.truncf %35 : vector<16x128xf32> to vector<16x128xbf16>
    %c0_13 = arith.constant 0 : index
    %c0_14 = arith.constant 0 : index
    %37 = vector.load %arg3[%c0_13, %c0_14] : memref<16x128xbf16, #tpu.memory_space<vmem>>, vector<16x128xbf16>
    tpu.vector_store %arg3[%c0_13, %c0_14], %36 {strides = array<i32>} : memref<16x128xbf16, #tpu.memory_space<vmem>>, vector<16x128xbf16>,
    return
  }
  func.func @transform_0(%arg0: i32) -> (i32, i32) {
    %c0_i32 = arith.constant 0 : i32
    %c0_i32_0 = arith.constant 0 : i32
    return %arg0, %c0_i32 : i32, i32
  }
  func.func @transform_1(%arg0: i32) -> (i32, i32) {
    %c0_i32 = arith.constant 0 : i32
    %c0_i32_0 = arith.constant 0 : i32
    %c0_i32_1 = arith.constant 0 : i32
    return %c0_i32, %c0_i32_0 : i32, i32
  }
  func.func @transform_2(%arg0: i32) -> (i32, i32) {
    %c0_i32 = arith.constant 0 : i32
    %c0_i32_0 = arith.constant 0 : i32
    return %arg0, %c0_i32 : i32, i32
  }
}

</mosaic_0001>

<bundles_post_ra>
// kernel: mlp_forward.2
= control target key start
LH: loop header
LB: loop body
LE: loop exit
PB: predicated region body
PF: predicated region fallthrough
CT: control target
= control target key end

     0   :  { %s739_s0 = inlined_call_operand.hbm [shape: bf16[400,128], index: 0, kind: input, shape index: {}]   ;;  %s740_s1 = inlined_call_operand.vmem [shape: bf16[8,10], index: 1, kind: input, shape index: {}]   ;;  %s741_s2 = inlined_call_operand.<no memory space> [shape: bf16[], index: 2, kind: input, shape index: {}]   ;;  %s742_s3 = inlined_call_operand.vmem [shape: bf16[16,128], index: 3, kind: output, shape index: {}]  }
   0x1   :  { %v8_v0 = vstv %s741_s2 }
   0x2   :  { %v9_v1 = vunpack.i.l.bf16 %v8_v0 }
   0x3   :  { %13 = vsyncpa [#allocation8], 0  ;;  %s658_s14 = smov [#allocation7]   ;;  %s634_s18 = scalar_lea.hbm %s739_s0, 3200 }
   0x4   :  { %s21_s15 = sshll.u32 %s658_s14, 4  ;;  %p635_p0 = scmp.ne.s32.totalorder %s739_s0, %s634_s18  ;;  %s22_s15 = int_to_ptr.vmem [resolvable:$true] %s21_s15 }
   0x5   :  { %p638_p1 = scmp.lt.u32.totalorder %s634_s18, %s739_s0 }
   0x7   :  { %p640_p2 = pnand %p638_p1, %p635_p0 }
   0x9   :  { %643 = shalt.err (!%p640_p2)
}
   0xa   :  { %s644_s2 = scalar_lea.vmem %s22_s15, 3200  ;;  %p649_p4 = scmp.lt.s32.totalorder %s22_s15, %s22_s15 }
   0xb   :  { %p645_p3 = scmp.ne.s32.totalorder %s22_s15, %s644_s2  ;;  %p650_p5 = scmp.lt.s32.totalorder %s644_s2, %s644_s2 }
   0xd   :  { %p651_p6 = por %p650_p5, %p649_p4 }
   0xf   :  { %p652_p7 = pnand %p651_p6, %p645_p3 }
  0x11   :  { %655 = shalt.err (!%p652_p7)
}
  0x12   :  { %s659_s23 = smov 64   ;;  %s660_s24 = smov 4  }
  0x13   :  { %27 = dma.hbm_to_vmem [thread:$0]  %s739_s0, 3200, %s22_s15, [#allocation8], %s659_s23, %s659_s23, %s660_s24  }
  0x14   :  { %656 = dma.done.wait [#allocation8], 3200  }
  0x15   :  { %657 = vsyncadd [#allocation8], 4294964096  ;;  %v661_v2 = vmov 0.0   ;;  %vm662_vm0 = vmmov 0   ;;  %v585_v3 = vld [vmem:[#allocation7] sm:$0xff]   ;;  %v43_v4 = vlaneseq  ;;  %v586_v5 = vld [vmem:[#allocation7 + $0x8] sm:$0xff]  }
  0x16   :  { %520 = vmatprep.subr.bf16.mxu0 %v661_v2  ;;  %536 = vmatprep.mubr.msk.bf16.mxu0 %vm662_vm0, %v661_v2  ;;  %v587_v7 = vld [vmem:[#allocation7 + $0x10] sm:$0xff]   ;;  %v588_v8 = vld [vmem:[#allocation7 + $0x18] sm:$0xff]   ;;  %v40_v9 = vld [vmem:[%s740_s1] sm:$0xf] }
  0x17   :  { %540 = vmatprep.subr.bf16.mxu1 %v661_v2  ;;  %556 = vmatprep.mubr.msk.bf16.mxu1 %vm662_vm0, %v661_v2  ;;  %v44_v6 = vand.u32 127, %v43_v4  ;;  %v41_v10 = vunpack.c.l.bf16 %v40_v9  ;;  %v589_v12 = vld [vmem:[#allocation7 + $0x20] sm:$0xff]   ;;  %v590_v14 = vld [vmem:[#allocation7 + $0x28] sm:$0xff]   ;;  %v591_v15 = vld [vmem:[#allocation7 + $0x30] sm:$0xff]   ;;  %v724_v26 = vshrl.u32 %v43_v4, 7 }
  0x18   :  { %521 = vmatpush3.bf16.msra.mxu0 %v585_v3  ;;  %v592_v16 = vld [vmem:[#allocation7 + $0x38] sm:$0xff]   ;;  %v594_v18 = vld [vmem:[#allocation7 + $0x40] sm:$0xff]   ;;  %v595_v19 = vld [vmem:[#allocation7 + $0x48] sm:$0xff]  }
  0x19   :  { %522 = vmatprep.subr.bf16.mxu0 %v661_v2  ;;  %vm46_vm1 = vcmp.lt.s32.totalorder %v44_v6, 10  ;;  %541 = vmatpush3.bf16.msra.mxu1 %v594_v18  ;;  %v596_v20 = vld [vmem:[#allocation7 + $0x50] sm:$0xff]   ;;  %v597_v21 = vld [vmem:[#allocation7 + $0x58] sm:$0xff]   ;;  %v598_v22 = vld [vmem:[#allocation7 + $0x60] sm:$0xff]   ;;  %v112_v29 = vsub.s32 0, %v724_v26  ;;  %v224_v54 = vsub.s32 1, %v724_v26 }
  0x1a   :  { %v47_v11 = vsel %vm46_vm1, %v41_v10, %v9_v1  ;;  %542 = vmatprep.subr.bf16.mxu1 %v661_v2  ;;  %v599_v23 = vld [vmem:[#allocation7 + $0x68] sm:$0xff]   ;;  %v600_v24 = vld [vmem:[#allocation7 + $0x70] sm:$0xff]   ;;  %v601_v25 = vld [vmem:[#allocation7 + $0x78] sm:$0xff]   ;;  %v330_v9 = vsub.s32 2, %v724_v26 }
  0x1b   :  { %v486_v13 = vpack.c.bf16 %v9_v1, %v47_v11  ;;  %v106_v27 = vld [vmem:[#allocation7 + $0xc0] sm:$0x1]  ;;  %v603_v47 = vld [vmem:[#allocation7 + $0x88] sm:$0xff]   ;;  %v604_v48 = vld [vmem:[#allocation7 + $0x90] sm:$0xff]  }
  0x1c   :  { %523 = vmatpush3.bf16.msra.mxu0 %v586_v5  ;;  %v107_v28 = vunpack.c.l.bf16 %v106_v27  ;;  %v602_v46 = vld [vmem:[#allocation7 + $0x80] sm:$0xff]   ;;  %v605_v49 = vld [vmem:[#allocation7 + $0x98] sm:$0xff]   ;;  %v607_v51 = vld [vmem:[#allocation7 + $0xa8] sm:$0xff]  }
  0x1d   :  { %524 = vmatprep.subr.bf16.mxu0 %v661_v2  ;;  %487 = vst [vmem:[#allocation9] sm:$0xff] %v486_v13   ;;  %543 = vmatpush3.bf16.msra.mxu1 %v595_v19  ;;  %v606_v50 = vld [vmem:[#allocation7 + $0xa0] sm:$0xff]   ;;  %v608_v52 = vld [vmem:[#allocation7 + $0xb0] sm:$0xff]   ;;  %v609_v53 = vld [vmem:[#allocation7 + $0xb8] sm:$0xff]  }
  0x1e   :  { %544 = vmatprep.subr.bf16.mxu1 %v661_v2  ;;  %v113_v30 = vrot.slane %v107_v28, %v112_v29  ;;  %v225_v55 = vrot.slane %v107_v28, %v224_v54 }
  0x20   :  { %525 = vmatpush3.bf16.msra.mxu0 %v587_v7  ;;  %v108_v7 = vld [vmem:[#allocation7 + $0xc0] sm:$0x2] }
  0x21   :  { %526 = vmatprep.subr.bf16.mxu0 %v661_v2  ;;  %545 = vmatpush3.bf16.msra.mxu1 %v596_v20 }
  0x22   :  { %546 = vmatprep.subr.bf16.mxu1 %v661_v2 }
  0x24   :  { %527 = vmatpush3.bf16.msra.mxu0 %v588_v8  ;;  %v593_v17 = vld [vmem:[#allocation9] sm:$0xff]   ;;  %v109_v8 = vunpack.c.l.bf16 %v108_v7 }
  0x25   :  { %528 = vmatprep.subr.bf16.mxu0 %v661_v2  ;;  %547 = vmatpush3.bf16.msra.mxu1 %v597_v21 }
  0x26   :  { %548 = vmatprep.subr.bf16.mxu1 %v661_v2  ;;  %v331_v10 = vrot.slane %v109_v8, %v330_v9 }
  0x28   :  { %529 = vmatpush3.bf16.msra.mxu0 %v589_v12 }
  0x29   :  { %530 = vmatprep.subr.bf16.mxu0 %v661_v2  ;;  %549 = vmatpush3.bf16.msra.mxu1 %v598_v22 }
  0x2a   :  { %550 = vmatprep.subr.bf16.mxu1 %v661_v2 }
  0x2c   :  { %531 = vmatpush3.bf16.msra.mxu0 %v590_v14 }
  0x2d   :  { %532 = vmatprep.subr.bf16.mxu0 %v661_v2  ;;  %551 = vmatpush3.bf16.msra.mxu1 %v599_v23 }
  0x2e   :  { %552 = vmatprep.subr.bf16.mxu1 %v661_v2 }
  0x30   :  { %533 = vmatpush3.bf16.msra.mxu0 %v591_v15 }
  0x31   :  { %534 = vmatprep.subr.bf16.mxu0 %v661_v2  ;;  %553 = vmatpush3.bf16.msra.mxu1 %v600_v24 }
  0x32   :  { %554 = vmatprep.subr.bf16.mxu1 %v661_v2 }
  0x34   :  { %535 = vmatpush3.bf16.msra.mxu0 %v592_v16 }
  0x35   :  { %560 = vmatprep.subr.bf16.mxu0 %v661_v2  ;;  %555 = vmatpush3.bf16.msra.mxu1 %v601_v25 }
  0x37   :  { %537 = vmatmul.mubr.bf16.vlgmr.msra.gmra.mrb[0].mxu0 %v593_v17 }
  0x38   :  { %576 = vmatprep.mubr.msk.bf16.mxu0 %vm662_vm0, %v661_v2  ;;  %561 = vmatpush3.bf16.msra.mxu0 %v602_v46 }
  0x39   :  { %562 = vmatprep.subr.bf16.mxu0 %v661_v2 }
  0x3c   :  { %563 = vmatpush3.bf16.msra.mxu0 %v603_v47 }
  0x3d   :  { %564 = vmatprep.subr.bf16.mxu0 %v661_v2 }
  0x40   :  { %565 = vmatpush3.bf16.msra.mxu0 %v604_v48 }
  0x41   :  { %566 = vmatprep.subr.bf16.mxu0 %v661_v2 }
  0x44   :  { %567 = vmatpush3.bf16.msra.mxu0 %v605_v49 }
  0x45   :  { %568 = vmatprep.subr.bf16.mxu0 %v661_v2 }
  0x48   :  { %569 = vmatpush3.bf16.msra.mxu0 %v606_v50 }
  0x49   :  { %570 = vmatprep.subr.bf16.mxu0 %v661_v2 }
  0x4c   :  { %571 = vmatpush3.bf16.msra.mxu0 %v607_v51 }
  0x4d   :  { %572 = vmatprep.subr.bf16.mxu0 %v661_v2 }
  0x50   :  { %573 = vmatpush3.bf16.msra.mxu0 %v608_v52 }
  0x51   :  { %574 = vmatprep.subr.bf16.mxu0 %v661_v2 }
  0x54   :  { %575 = vmatpush3.bf16.msra.mxu0 %v609_v53 }
 0x10a   :  { %v202_v31 = vpop.f32.mrb[0].mxu0 }
 0x10b   :  { %v203_v32 = vadd.f32 %v202_v31, %v113_v30  ;;  %v538_v33 = vpop.f32.mrb[1].mxu0 }
 0x10c   :  { %v205_v34 = vpop.f32.mrb[2].mxu0 }
 0x10d   :  { %v457_v35 = vmul.f32 -1.442695, %v203_v32  ;;  %v206_v36 = vadd.f32 %v205_v34, %v113_v30  ;;  %v539_v37 = vpop.f32.mrb[3].mxu0 }
 0x10f   :  { %610 = vpow2.f32 %v457_v35  ;;  %v458_v38 = vmul.f32 -1.442695, %v206_v36 }
 0x111   :  { %612 = vpow2.f32 %v458_v38 }
 0x119   :  { %v611_v39 = vpop.eup %610 }
 0x11a   :  { %v215_v40 = vadd.f32 1.0, %v611_v39 }
 0x11b   :  { %v613_v41 = vpop.eup %612 }
 0x11c   :  { %v216_v42 = vadd.f32 1.0, %v613_v41  ;;  %614 = vrcp.f32 %v215_v40 }
 0x11e   :  { %616 = vrcp.f32 %v216_v42 }
 0x126   :  { %v615_v43 = vpop.eup %614 }
 0x128   :  { %v617_v44 = vpop.eup %616 }
 0x129   :  { %v221_v45 = vpack.c.bf16 %v617_v44, %v615_v43 }
 0x12b   :  { %557 = vmatmul.mubr.bf16.vlgmr.msra.gmra.mrb[0].mxu1 %v221_v45 }
 0x1fe   :  { %v308_v56 = vpop.f32.mrb[0].mxu1 }
 0x1ff   :  { %v309_v57 = vadd.f32 %v308_v56, %v225_v55  ;;  %v558_v58 = vpop.f32.mrb[1].mxu1 }
 0x200   :  { %v311_v59 = vpop.f32.mrb[2].mxu1 }
 0x201   :  { %v467_v60 = vmul.f32 -1.442695, %v309_v57  ;;  %v312_v61 = vadd.f32 %v311_v59, %v225_v55  ;;  %v559_v62 = vpop.f32.mrb[3].mxu1 }
 0x203   :  { %618 = vpow2.f32 %v467_v60  ;;  %v468_v63 = vmul.f32 -1.442695, %v312_v61 }
 0x205   :  { %620 = vpow2.f32 %v468_v63 }
 0x20d   :  { %v619_v0 = vpop.eup %618 }
 0x20e   :  { %v321_v1 = vadd.f32 1.0, %v619_v0 }
 0x20f   :  { %v621_v3 = vpop.eup %620 }
 0x210   :  { %v322_v4 = vadd.f32 1.0, %v621_v3  ;;  %622 = vrcp.f32 %v321_v1 }
 0x212   :  { %624 = vrcp.f32 %v322_v4 }
 0x21a   :  { %v623_v2 = vpop.eup %622 }
 0x21c   :  { %v625_v5 = vpop.eup %624 }
 0x21d   :  { %v327_v6 = vpack.c.bf16 %v625_v5, %v623_v2 }
 0x21f   :  { %577 = vmatmul.mubr.bf16.vlgmr.msra.gmra.mrb[4].mxu0 %v327_v6 }
 0x2f2   :  { %v414_v11 = vpop.f32.mrb[4].mxu0 }
 0x2f3   :  { %v415_v12 = vadd.f32 %v414_v11, %v331_v10  ;;  %v578_v13 = vpop.f32.mrb[5].mxu0 }
 0x2f4   :  { %v417_v14 = vpop.f32.mrb[6].mxu0 }
 0x2f5   :  { %v477_v15 = vmul.f32 -1.442695, %v415_v12  ;;  %v418_v16 = vadd.f32 %v417_v14, %v331_v10  ;;  %v579_v17 = vpop.f32.mrb[7].mxu0 }
 0x2f7   :  { %626 = vpow2.f32 %v477_v15  ;;  %v478_v18 = vmul.f32 -1.442695, %v418_v16 }
 0x2f9   :  { %628 = vpow2.f32 %v478_v18 }
 0x301   :  { %v627_v19 = vpop.eup %626 }
 0x302   :  { %v427_v20 = vadd.f32 1.0, %v627_v19 }
 0x303   :  { %v629_v21 = vpop.eup %628 }
 0x304   :  { %v428_v22 = vadd.f32 1.0, %v629_v21  ;;  %630 = vrcp.f32 %v427_v20 }
 0x306   :  { %632 = vrcp.f32 %v428_v22 }
 0x30e   :  { %v631_v23 = vpop.eup %630 }
 0x310   :  { %v633_v24 = vpop.eup %632 }
 0x311   :  { %v491_v25 = vpack.c.bf16 %v633_v24, %v631_v23 }
 0x313   :  { %492 = vst [vmem:[%s742_s3] sm:$0xff] %v491_v25  }
 0x314   :  { %447 = vsyncpa [#allocation8], 1 }

</bundles_post_ra>
